<compile_context>
chip_gen: v6e
topology: v6e:2x2x1
jax: 0.10.0
libtpu: 0.0.40
codegen_flags: <defaults>
</compile_context>

<pallas_src>
import functools
import math

import jax
import jax.numpy as jnp
from jax import lax
from jax.experimental import pallas as pl
from jax.experimental.pallas import tpu as pltpu


# ------------------------------ Kernel body ------------------------------

def _dense_gelu_kernel(x_ref, w_ref, b_ref, o_ref, acc_ref, *, mxu_dtype):
    # Blocks:
    #   x:   (tm, tk)   activations
    #   w:   (tk, tn)   weight, already transposed to (K, N) -> MXU-native
    #   b:   (1,  tn)   bias
    #   out: (tm, tn)
    #   acc: (tm, tn)   fp32 accumulator (VMEM scratch, persists over k axis)
    k = pl.program_id(2)

    @pl.when(k == 0)
    def _():
        acc_ref[...] = jnp.zeros_like(acc_ref)

    x = x_ref[...]
    w = w_ref[...]
    if mxu_dtype is not None and x.dtype != mxu_dtype:
        x = x.astype(mxu_dtype)
    if mxu_dtype is not None and w.dtype != mxu_dtype:
        w = w.astype(mxu_dtype)

    acc_ref[...] += jnp.dot(x, w, preferred_element_type=jnp.float32)

    @pl.when(k == pl.num_programs(2) - 1)
    def _():
        y = acc_ref[...] + b_ref[...].astype(jnp.float32)
        # Exact (erf-based) GELU == ACT2FN["gelu"] / torch.nn.GELU default.
        y = 0.5 * y * (1.0 + lax.erf(y * (1.0 / math.sqrt(2.0))))
        o_ref[...] = y.astype(o_ref.dtype)


# --------------------------- Tile selection -------------------------------

def _vmem_capacity_bytes():
    try:
        return int(pltpu.get_tpu_info().vmem_capacity_bytes)
    except Exception:
        return 64 << 20  # conservative (v7x per-TensorCore VMEM)


def _candidates(dim, preferred):
    """Full dim first, then preferred tile sizes that evenly divide dim."""
    cands = [dim] + [c for c in preferred if c < dim and dim % c == 0]
    seen, out = set(), []
    for c in cands:
        if c not in seen:
            seen.add(c)
            out.append(c)
    return out


def _working_set_bytes(tm, tn, tk, x_isz, w_isz, b_isz, o_isz):
    # Double-buffered x/w/bias/out tiles + single fp32 accumulator.
    return (2 * (tm * tk * x_isz + tk * tn * w_isz + tn * b_isz + tm * tn * o_isz)
            + 4 * tm * tn)


def _choose_tiles(M, N, K, x_isz, w_isz, b_isz, o_isz, budget):
    tm_c = _candidates(M, (2048, 1024, 512, 256, 128, 64, 32, 16, 8))
    tn_c = _candidates(N, (1536, 1024, 768, 512, 384, 256, 128))
    tk_c = _candidates(K, (2048, 1536, 1024, 768, 512, 384, 256, 128))

    def traffic(tm, tn):
        return (M * K * x_isz * (N // tn)
                + N * K * w_isz * (M // tm)
                + M * N * o_isz)

    best_fit = None     # (score, (tm, tn, tk, ws))
    best_any = None     # smallest working set fallback
    for tk in tk_c:
        for tn in tn_c:
            for tm in tm_c:
                ws = _working_set_bytes(tm, tn, tk, x_isz, w_isz, b_isz, o_isz)
                single_core = (M // tm) * (N // tn) < 2
                score = (traffic(tm, tn) * (2 if single_core else 1),
                         K // tk,            # fewer reduction passes preferred
                         -(tm * tn))
                if ws <= budget and (best_fit is None or score < best_fit[0]):
                    best_fit = (score, (tm, tn, tk, ws))
                if best_any is None or ws < best_any[0]:
                    best_any = (ws, (tm, tn, tk, ws))
    return best_fit[1] if best_fit is not None else best_any[1]


# ------------------------------- Wrapper ----------------------------------

def electra_intermediate(hidden_states, weight, bias, *, mxu_dtype="auto"):
    """y = gelu(hidden_states @ weight.T + bias).

    hidden_states: (..., hidden_size)
    weight:        (intermediate_size, hidden_size)   (PyTorch nn.Linear layout)
    bias:          (intermediate_size,)
    Returns:       (..., intermediate_size)
    """
    orig_shape = hidden_states.shape
    K = orig_shape[-1]                 # hidden_size
    N = weight.shape[0]                # intermediate_size
    out_dtype = hidden_states.dtype

    x2d = hidden_states.reshape(-1, K)
    M = x2d.shape[0]

    # Pad ragged M (= batch*seq) so sublane/lane-friendly tiles always exist.
    pad_unit = 8 if M <= 128 else 128
    Mp = ((M + pad_unit - 1) // pad_unit) * pad_unit
    if Mp != M:
        x2d = jnp.pad(x2d, ((0, Mp - M), (0, 0)))

    # MXU input precision: bf16 for f32 models (f32 accumulate), else passthrough.
    if mxu_dtype == "auto":
        mxu_dtype = jnp.bfloat16 if jnp.dtype(out_dtype) == jnp.float32 else None

    # Pre-transpose W once to (K, N): MXU-native orientation, lane-dense in N.
    # It's a layer constant in a real model, so the transpose/cast is amortized.
    w_t = weight.T
    if mxu_dtype is not None:
        w_t = w_t.astype(mxu_dtype)     # also halves weight HBM streaming
    b2d = bias.reshape(1, N)

    x_isz = jnp.dtype(x2d.dtype).itemsize
    w_isz = jnp.dtype(w_t.dtype).itemsize
    b_isz = jnp.dtype(b2d.dtype).itemsize
    o_isz = jnp.dtype(out_dtype).itemsize

    cap = _vmem_capacity_bytes()
    budget = min((cap * 3) // 4, 100 << 20)   # ~48 MiB on v7x, ~96 MiB on v5e/v6e
    tm, tn, tk, working = _choose_tiles(Mp, N, K, x_isz, w_isz, b_isz, o_isz, budget)

    grid = (Mp // tm, N // tn, K // tk)

    vmem_limit = int(min((cap * 98) // 100, max(32 << 20, working + (8 << 20))))

    cost = pl.CostEstimate(
        flops=2 * Mp * N * K,
        transcendentals=Mp * N,
        bytes_accessed=(Mp * K * x_isz * grid[1]
                        + N * K * w_isz * grid[0]
                        + Mp * N * o_isz + N * b_isz))

    kernel = functools.partial(_dense_gelu_kernel, mxu_dtype=mxu_dtype)

    out2d = pl.pallas_call(
        kernel,
        out_shape=jax.ShapeDtypeStruct((Mp, N), out_dtype),
        grid_spec=pltpu.PrefetchScalarGridSpec(
            num_scalar_prefetch=0,
            grid=grid,
            in_specs=[
                pl.BlockSpec((tm, tk), lambda i, j, k: (i, k)),   # x
                pl.BlockSpec((tk, tn), lambda i, j, k: (k, j)),   # W.T (K, N)
                pl.BlockSpec((1, tn), lambda i, j, k: (0, j)),    # bias
            ],
            out_specs=pl.BlockSpec((tm, tn), lambda i, j, k: (i, j)),
            scratch_shapes=[pltpu.VMEM((tm, tn), jnp.float32)]),
        compiler_params=pltpu.CompilerParams(
            dimension_semantics=("parallel", "parallel", "arbitrary"),
            vmem_limit_bytes=vmem_limit),
        cost_estimate=cost,
    )(x2d, w_t, b2d)

    if Mp != M:
        out2d = out2d[:M]
    return out2d.reshape(*orig_shape[:-1], N)


# ------------------------------- Reference --------------------------------

def reference_intermediate(hidden_states, weight, bias, *, mxu_dtype=None):
    x = hidden_states
    w_t = weight.T
    if mxu_dtype is not None:
        x = x.astype(mxu_dtype)
        w_t = w_t.astype(mxu_dtype)
    y = jnp.dot(x, w_t, preferred_element_type=jnp.float32) + bias.astype(jnp.float32)
    y = jax.nn.gelu(y, approximate=False)
    return y.astype(hidden_states.dtype)


# --------------------------------- Main ------------------------------------

if __name__ == "__main__":
    # Small shapes consistent with the module: batch=2, seq=8, hidden=32,
    # intermediate = 4 * hidden = 128.
    B, S, H, I = 2, 8, 32, 128

    key = jax.random.PRNGKey(0)
    k_x, k_w, k_b = jax.random.split(key, 3)

    hidden_states = jax.random.normal(k_x, (B, S, H), dtype=jnp.float32)
    weight = 0.3 * jax.random.normal(k_w, (I, H), dtype=jnp.float32)
    bias = 0.3 * jax.random.normal(k_b, (I,), dtype=jnp.float32)

    out = electra_intermediate(hidden_states, weight, bias)
    out = jax.block_until_ready(out)

    # Reference computed at the same MXU input precision (bf16 operands,
    # f32 accumulation + f32 exact GELU epilogue) as the kernel.
    ref = reference_intermediate(hidden_states, weight, bias, mxu_dtype=jnp.bfloat16)

    assert out.shape == (B, S, I), out.shape
    max_err = float(jnp.max(jnp.abs(out - ref)))
    assert jnp.allclose(out, ref, atol=5e-3, rtol=5e-3), f"max abs err = {max_err}"

    print("KERNEL_OK")
</pallas_src>

<mosaic_0001>
module attributes {stable_mosaic.version = 11 : i64} {
  func.func @_dense_gelu_kernel(%arg0: i32, %arg1: i32, %arg2: i32, %arg3: memref<8x32xf32, #tpu.memory_space<vmem>>, %arg4: memref<32x128xbf16, #tpu.memory_space<vmem>>, %arg5: memref<1x128xf32, #tpu.memory_space<vmem>>, %arg6: memref<8x128xf32, #tpu.memory_space<vmem>>, %arg7: memref<8x128xf32, #tpu.memory_space<vmem>>) attributes {dimension_semantics = [#tpu.dimension_semantics<parallel>, #tpu.dimension_semantics<parallel>, #tpu.dimension_semantics<arbitrary>], iteration_bounds = array<i64: 2, 1, 1>, scalar_prefetch = 0 : i64, scratch_operands = 1 : i64, tpu.core_type = #tpu.core_type<tc>, window_params = [{transform_indices = @transform_0, window_bounds = array<i64: 8, 32>}, {transform_indices = @transform_1, window_bounds = array<i64: 32, 128>}, {transform_indices = @transform_2, window_bounds = array<i64: 1, 128>}, {transform_indices = @transform_3, window_bounds = array<i64: 8, 128>}]} {
    %c0_i32 = arith.constant 0 : i32
    %0 = arith.cmpi eq, %arg2, %c0_i32 : i32
    %1 = arith.extui %0 : i1 to i32
    %c0_i32_0 = arith.constant 0 : i32
    %2 = arith.cmpi ne, %1, %c0_i32_0 : i32
    scf.if %2 {
      %cst_10 = arith.constant 0.000000e+00 : f32
      %13 = vector.broadcast %cst_10 : f32 to vector<8x128xf32>
      %c0_11 = arith.constant 0 : index
      %c0_12 = arith.constant 0 : index
      %14 = vector.load %arg7[%c0_11, %c0_12] : memref<8x128xf32, #tpu.memory_space<vmem>>, vector<8x128xf32>
      tpu.vector_store %arg7[%c0_11, %c0_12], %13 {strides = array<i32>} : memref<8x128xf32, #tpu.memory_space<vmem>>, vector<8x128xf32>,
    } else {
    }
    %c0 = arith.constant 0 : index
    %c0_1 = arith.constant 0 : index
    %3 = vector.load %arg3[%c0, %c0_1] : memref<8x32xf32, #tpu.memory_space<vmem>>, vector<8x32xf32>
    %c0_2 = arith.constant 0 : index
    %c0_3 = arith.constant 0 : index
    %4 = vector.load %arg4[%c0_2, %c0_3] : memref<32x128xbf16, #tpu.memory_space<vmem>>, vector<32x128xbf16>
    %5 = arith.truncf %3 : vector<8x32xf32> to vector<8x32xbf16>
    %c0_4 = arith.constant 0 : index
    %c0_5 = arith.constant 0 : index
    %6 = vector.load %arg7[%c0_4, %c0_5] : memref<8x128xf32, #tpu.memory_space<vmem>>, vector<8x128xf32>
    %cst = arith.constant dense<0.000000e+00> : vector<8x128xf32>
    %7 = tpu.matmul %5, %4, %cst {dimension_numbers = #tpu.dot_dimension_numbers<[1], [0], [0], [1], [0, 0, 1, 1], [], []>} : vector<8x32xbf16>, vector<32x128xbf16>, vector<8x128xf32> -> vector<8x128xf32>
    %8 = arith.addf %6, %7 : vector<8x128xf32>
    %c0_6 = arith.constant 0 : index
    %c0_7 = arith.constant 0 : index
    %9 = vector.load %arg7[%c0_6, %c0_7] : memref<8x128xf32, #tpu.memory_space<vmem>>, vector<8x128xf32>
    tpu.vector_store %arg7[%c0_6, %c0_7], %8 {strides = array<i32>} : memref<8x128xf32, #tpu.memory_space<vmem>>, vector<8x128xf32>,
    %c0_i32_8 = arith.constant 0 : i32
    %10 = arith.cmpi eq, %arg2, %c0_i32_8 : i32
    %11 = arith.extui %10 : i1 to i32
    %c0_i32_9 = arith.constant 0 : i32
    %12 = arith.cmpi ne, %11, %c0_i32_9 : i32
    scf.if %12 {
      %c0_10 = arith.constant 0 : index
      %c0_11 = arith.constant 0 : index
      %13 = vector.load %arg7[%c0_10, %c0_11] : memref<8x128xf32, #tpu.memory_space<vmem>>, vector<8x128xf32>
      %c0_12 = arith.constant 0 : index
      %c0_13 = arith.constant 0 : index
      %14 = vector.load %arg5[%c0_12, %c0_13] : memref<1x128xf32, #tpu.memory_space<vmem>>, vector<1x128xf32>
      %15 = vector.broadcast %14 : vector<1x128xf32> to vector<8x128xf32>
      %16 = arith.addf %13, %15 : vector<8x128xf32>
      %cst_14 = arith.constant 5.000000e-01 : f32
      %17 = vector.broadcast %cst_14 : f32 to vector<8x128xf32>
      %18 = arith.mulf %17, %16 : vector<8x128xf32>
      %cst_15 = arith.constant 0.707106769 : f32
      %19 = vector.broadcast %cst_15 : f32 to vector<8x128xf32>
      %20 = arith.mulf %16, %19 : vector<8x128xf32>
      %21 = math.erf %20 : vector<8x128xf32>
      %cst_16 = arith.constant 1.000000e+00 : f32
      %22 = vector.broadcast %cst_16 : f32 to vector<8x128xf32>
      %23 = arith.addf %22, %21 : vector<8x128xf32>
      %24 = arith.mulf %18, %23 : vector<8x128xf32>
      %c0_17 = arith.constant 0 : index
      %c0_18 = arith.constant 0 : index
      %25 = vector.load %arg6[%c0_17, %c0_18] : memref<8x128xf32, #tpu.memory_space<vmem>>, vector<8x128xf32>
      tpu.vector_store %arg6[%c0_17, %c0_18], %24 {strides = array<i32>} : memref<8x128xf32, #tpu.memory_space<vmem>>, vector<8x128xf32>,
    } else {
    }
    return
  }
  func.func @transform_0(%arg0: i32, %arg1: i32, %arg2: i32) -> (i32, i32) {
    %c0_i32 = arith.constant 0 : i32
    return %arg0, %arg2 : i32, i32
  }
  func.func @transform_1(%arg0: i32, %arg1: i32, %arg2: i32) -> (i32, i32) {
    %c0_i32 = arith.constant 0 : i32
    return %arg2, %arg1 : i32, i32
  }
  func.func @transform_2(%arg0: i32, %arg1: i32, %arg2: i32) -> (i32, i32) {
    %c0_i32 = arith.constant 0 : i32
    %c0_i32_0 = arith.constant 0 : i32
    return %c0_i32, %arg1 : i32, i32
  }
  func.func @transform_3(%arg0: i32, %arg1: i32, %arg2: i32) -> (i32, i32) {
    %c0_i32 = arith.constant 0 : i32
    return %arg0, %arg1 : i32, i32
  }
}

</mosaic_0001>

<bundles_post_ra>
// kernel: tpu_custom_call.1
= control target key start
LH: loop header
LB: loop body
LE: loop exit
PB: predicated region body
PF: predicated region fallthrough
CT: control target
= control target key end

     0   :  { %8 = vsyncpa [#allocation4], 0  ;;  %s917_s0 = inlined_call_operand.hbm [shape: f32[16,32], index: 0, kind: input, shape index: {}]   ;;  %s918_s1 = inlined_call_operand.hbm [shape: bf16[32,128], index: 1, kind: input, shape index: {}]   ;;  %s919_s2 = inlined_call_operand.vmem [shape: f32[1,128], index: 2, kind: input, shape index: {}]   ;;  %s920_s3 = inlined_call_operand.hbm [shape: f32[16,128], index: 3, kind: output, shape index: {}]  }
   0x1   :  { %10 = vsyncpa [#allocation4 + $0x1], 0 }
   0x2   :  { %11 = vsyncpa [#allocation7], 0 }
   0x3   :  { %12 = vsyncpa [#allocation5], 0 }
   0x4   :  { %14 = vsyncpa [#allocation5 + $0x1], 0  ;;  %s743_s12 = smov 0   ;;  %s745_s13 = smov 0  }
   0x5   :  { %s747_s14 = smov 0   ;;  %s749_s15 = smov 0  }
   0x6   :  { %s751_s16 = smov 0   ;;  %s753_s17 = smov 0  }
   0x7 LB: > { %s464_s18 = sadd.s32 4294967295, %s714_s17   ;;  %s465_s19 = sadd.s32 4294967294, %s714_s17   ;;  %s714_s17 = sphi %s753_s17, %s20_s17   ;;  %s710_s16 = sphi %s751_s16, %s938_s16   ;;  %s706_s15 = sphi %s749_s15, %s937_s15   ;;  %s702_s14 = sphi %s747_s14, %s936_s14   ;;  %s698_s13 = sphi %s745_s13, %s935_s13   ;;  %s694_s12 = sphi %s743_s12, %s934_s12  }
   0x8   : > { %p61_p0 = scmp.ne.s32.totalorder %s698_s13, %s694_s12  ;;  %p777_p1 = scmp.eq.s32.totalorder %s464_s18, 0 }
   0x9   : > { %p781_p2 = scmp.eq.s32.totalorder %s464_s18, 1  ;;  %p147_p3 = scmp.eq.s32.totalorder %s465_s19, 1 }
   0xa   : > { %p787_p4 = por %p777_p1, %p61_p0  ;;  %p466_p5 = scmp.ge.s32.totalorder %s714_s17, 1 }
   0xb   : > { %p792_p6 = por %p147_p3, %p61_p0  ;;  %p154_p7 = scmp.lt.s32.totalorder %s714_s17, 3 }
   0xc   : > { %s924_s22 = scalar_select %p787_p4, 1, 0 }
   0xd   : > { %s925_s23 = scalar_select %p792_p6, 1, 0 }
   0xe   : > { %p797_p8 = pnand %p466_p5, %p154_p7  ;;  %s716_s25 = smov [#allocation6]  }
   0xf   : > { %s170_s26 = sshll.u32 %s716_s25, 4  ;;  %s39_s28 = sadd.s32 1, %s710_s16  ;;  %s171_s26 = int_to_ptr.vmem [resolvable:$true] %s170_s26 }
  0x10   : > { %p503_p9 = pneg %p797_p8  ;;  %s587_s29 = scalar_lea.vmem %s171_s26, 256 }
  0x11   : > { %p588_p13 = scmp.ne.s32.totalorder %s171_s26, %s587_s29  ;;  %p595_p5 = scmp.lt.s32.totalorder %s171_s26, %s171_s26 }
  0x12   : > { %p806_p11 = pnand %p503_p9, %p777_p1  ;;  %p596_p7 = scmp.lt.s32.totalorder %s587_s29, %s587_s29 }
  0x14   : > { %p578_p12 = pneg %p806_p11  ;;  %p597_p6 = por %p596_p7, %p595_p5 }
  0x16   : > { %p590_p0 = pnand %p588_p13, %p578_p12 }
  0x18   : > { %p591_p3 = pneg %p590_p0 }
  0x1a   : > { %p598_p4 = pnand %p597_p6, %p591_p3 }
  0x1c   : > { %601 = shalt.err (!%p598_p4)
}
  0x1d   : > { %s717_s30 = smov 64   ;;  %s718_s4 = smov 4  }
  0x1e   : > { %506 = dma.hbm_to_vmem [thread:$0]  (!%p806_p11), %s918_s1, 256, %s171_s26, [#allocation7], %s717_s30, %s717_s30, %s718_s4  }
  0x1f   : > { %p41_p6 = scmp.ge.s32.totalorder %s39_s28, 2  ;;  %s48_s7 = sadd.s32 1, %s702_s14 }
  0x20   : > { %p55_p4 = scmp.ne.s32.totalorder %s702_s14, %s698_s13  ;;  %p56_p9 = scmp.eq.s32.totalorder %s714_s17, 0 }
  0x21   : > { %s940_s28 = smov (%p41_p6, %s39_s28), 0  ;;  %p516_p0 = scmp.lt.s32.totalorder %s714_s17, 2 }
  0x22   : > { %p824_p12 = por %p56_p9, %p55_p4  ;;  %p830_p13 = por %p781_p2, %p55_p4 }
  0x23   : > { %s43_s10 = ssub.s32 %s710_s16, %s940_s28  ;;  %s190_s11 = sand.u32 1, %s702_s14  }
  0x24   : > { %p46_p11 = scmp.eq.s32.totalorder %s43_s10, 0  ;;  %s470_s18 = sshll.u32 %s190_s11, 3 }
  0x25   : > { %s471_s25 = sshll.u32 %s710_s16, 7  ;;  %s194_s30 = scalar_lea.vmem [#allocation3], %s470_s18 }
  0x26   : > { %s839_s19 = scalar_select %p46_p11, %s702_s14, %s48_s7  }
  0x27   : > { %s200_s29 = scalar_lea.hbm %s917_s0, %s471_s25  ;;  %s202_s4 = sshll.u32 %s194_s30, 4  ;;  %s203_s4 = int_to_ptr.vmem [resolvable:$true] %s202_s4 }
  0x28   : > { %p847_p2 = pnand %p516_p0, %p824_p12  ;;  %s191_s5 = scalar_lea.sflag [#allocation4], %s190_s11 }
  0x29   : > { %s615_s6 = scalar_lea.vmem %s203_s4, 128  ;;  %s719_s7 = smov [#allocation3]  }
  0x2a   : > { %p604_p3 = pneg %p847_p2  ;;  %p616_p5 = scmp.ne.s32.totalorder %s203_s4, %s615_s6 }
  0x2b   : > { %s620_s10 = sshll.u32 %s719_s7, 4  ;;  %s621_s10 = int_to_ptr.vmem [resolvable:$false] %s620_s10 }
  0x2c   : > { %p618_p7 = pnand %p616_p5, %p604_p3  ;;  %s622_s25 = scalar_lea.vmem %s621_s10, 256 }
  0x2d   : > { %p623_p4 = scmp.lt.s32.totalorder %s203_s4, %s621_s10  ;;  %p624_p9 = scmp.lt.s32.totalorder %s622_s25, %s615_s6 }
  0x2e   : > { %p619_p6 = pneg %p618_p7 }
  0x2f   : > { %p625_p11 = por %p624_p9, %p623_p4 }
  0x31   : > { %p626_p10 = pnand %p625_p11, %p619_p6 }
  0x33   : > { %629 = shalt.err (!%p626_p10)
}
  0x34   : > { %510 = dma.hbm_to_vmem [thread:$0]  (!%p847_p2), %s200_s29, 128, %s203_s4, %s191_s5  }
  0x35   : > { %211 = sbr.rel (%p797_p8) target bundleno = 298 (0x12a), region = 32  ;;  %s858_s8 = sand.u32 (!%p797_p8), 1, %s698_s13  }
  0x36   : > { %s473_s11 = sshll.u32 (!%p797_p8), %s858_s8, 3  ;;  %s214_s18 = scalar_lea.sflag (!%p797_p8), [#allocation4], %s858_s8 }
  0x37   : > { %s217_s26 = scalar_lea.vmem (!%p797_p8), [#allocation3], %s473_s11  ;;  %p931_p12 = scmp.ne.s32.totalorder (!%p797_p8), %s924_s22, 0 }
  0x3a   : > { %681 = dma.done.wait (%p931_p12), %s214_s18, 128  }
  0x3b   : > { %683 = vsyncadd (%p931_p12), %s214_s18, 4294967168 }
  0x3c   : > { %685 = dma.done.wait (%p777_p1), [#allocation7], 256  }
  0x3d   : > { %687 = vsyncadd (%p777_p1), [#allocation7], 4294967040  ;;  %v720_v0 = vmov 0.0   ;;  %vm721_vm0 = vmmov 0   ;;  %v572_v1 = vld [vmem:[#allocation6 + $0x8] sm:$0xff]   ;;  %v573_v2 = vld [vmem:[#allocation6] sm:$0xff]  }
  0x3e   : > { %487 = vmatprep.subr.bf16.mxu0 %v720_v0  ;;  %491 = vmatprep.mubr.msk.bf16.mxu0 %vm721_vm0, %v720_v0  ;;  %v257_v3 = vld [vmem:[%s217_s26] sm:$0xff]  ;;  %vm276_vm1 = vcmask 261120   ;;  %s481_s20 = sshll.u32 %s706_s15, 7  ;;  %s246_s27 = scalar_lea.vmem [#allocation8], %s473_s11 }
  0x3f   : > { %488 = vmatpush3.bf16.msra.mxu0 %v572_v1  ;;  %v262_v4 = vpack.c.bf16 %v257_v3, %v257_v3  ;;  %v479_v5 = vld [vmem:[%s919_s2] ss:$0 sm:$0xff]  ;;  %s355_s29 = sshll.u32 %s246_s27, 4  ;;  %s353_s21 = scalar_lea.hbm %s920_s3, %s481_s20  ;;  %s356_s29 = int_to_ptr.vmem [resolvable:$true] %s355_s29 }
  0x40   : > { %489 = vmatprep.subr.bf16.mxu0 %v720_v0  ;;  %s341_s5 = scalar_lea.sflag [#allocation5], %s858_s8  ;;  %s630_s6 = scalar_lea.vmem %s356_s29, 128 }
  0x41   : > { %p631_p1 = scmp.ne.s32.totalorder %s356_s29, %s630_s6  ;;  %s722_s7 = smov [#allocation8]  }
  0x42   : > { %s634_s15 = sshll.u32 %s722_s7, 4  ;;  %s635_s15 = int_to_ptr.vmem [resolvable:$false] %s634_s15 }
  0x43   : > { %490 = vmatpush3.bf16.msra.mxu0 %v573_v2  ;;  %p632_p8 = pnand %p631_p1, %p830_p13  ;;  %s636_s10 = scalar_lea.vmem %s635_s15, 256 }
  0x44   : > { %p637_p0 = scmp.lt.s32.totalorder %s356_s29, %s635_s15  ;;  %p638_p2 = scmp.lt.s32.totalorder %s636_s10, %s630_s6 }
  0x45   : > { %p633_p10 = pneg %p632_p8 }
  0x46   : > { %492 = vmatmul.mubr.msk.bf16.vlgmr.msra.gmra.mxu0 %vm276_vm1, %v262_v4  ;;  %p639_p3 = por %p638_p2, %p637_p0 }
  0x48   : > { %p640_p5 = pnand %p639_p3, %p633_p10 }
 0x106   : > { %v314_v6 = vpop.f32.mrf.mxu0 }
 0x107   : > { %v333_v7 = vadd.f32 %v479_v5, %v314_v6 }
 0x108   : > { %v493_v8 = vpop.f32.mrf.mxu0 }
 0x109   : > { %v335_v9 = vmul.f32 0.70710677, %v333_v7  ;;  %v334_v13 = vmul.f32 0.5, %v333_v7 }
 0x10a   : > { %v317_v10 = vpop.f32.mrf.mxu0 }
 0x10b   : > { %574 = verf.f32 %v335_v9 }
 0x10c   : > { %v494_v11 = vpop.f32.mrf.mxu0 }
 0x118   : > { %v575_v12 = vpop.eup %574 }
 0x119   : > { %v337_v14 = vadd.f32 1.0, %v575_v12 }
 0x11b   : > { %v338_v15 = vmul.f32 %v337_v14, %v334_v13 }
 0x11d   : > { %339 = vst [vmem:[%s246_s27] sm:$0xff] %v338_v15 }
 0x11e   : > { %643 = shalt.err (!%p640_p5)
}
 0x11f   : > { %s644_s25 = scalar_lea.hbm %s353_s21, 128  ;;  %s648_s18 = scalar_lea.hbm %s920_s3, 256 }
 0x120   : > { %p645_p7 = scmp.ne.s32.totalorder %s353_s21, %s644_s25  ;;  %p649_p9 = scmp.lt.s32.totalorder %s353_s21, %s920_s3 }
 0x121   : > { %p650_p11 = scmp.lt.s32.totalorder %s648_s18, %s644_s25 }
 0x122   : > { %p646_p6 = pnand %p645_p7, %p830_p13 }
 0x123   : > { %p651_p12 = por %p650_p11, %p649_p9 }
 0x124   : > { %p647_p4 = pneg %p646_p6 }
 0x126   : > { %p652_p1 = pnand %p651_p12, %p647_p4 }
 0x128   : > { %655 = shalt.err (!%p652_p1)
}
 0x129   : > { %501 = dma.vmem_to_hbm [thread:$0]  (%p830_p13), %s356_s29, 128, %s353_s21, %s341_s5  }
 0x12a PF: > { %s367_s24 = sand.u32 1, %s694_s12   ;;  %p932_p8 = scmp.ne.s32.totalorder %s925_s23, 0 }
 0x12b   : > { %p933_p10 = scmp.ge.s32.totalorder %s714_s17, 2  ;;  %s368_s20 = scalar_lea.sflag [#allocation5], %s367_s24 }
 0x12d   : > { %p512_p0 = pnand %p933_p10, %p932_p8 }
 0x12f   : > { %p513_p2 = pneg %p512_p0 }
 0x131   : > { %689 = dma.done.wait (%p513_p2), %s368_s20, 128  }
 0x132   : > { %691 = vsyncadd (%p513_p2), %s368_s20, 4294967168  ;;  %s20_s17 = sadd.s32 1, %s714_s17   ;;  %s934_s12 = smov %s698_s13 }
 0x133   : > { %p17_p3 = scmp.ge.s32.totalorder %s20_s17, 4   ;;  %s935_s13 = smov %s702_s14 }
 0x134   : > { %s936_s14 = smov %s839_s19  ;;  %s937_s15 = smov %s710_s16 }
 0x135   : > { %s938_s16 = smov %s940_s28  ;;  %19 = sbr.rel (!%p17_p3) target bundleno = 7 (0x7), region = 93 }
 0x13a   :  { %373 = vsyncpa [#allocation4], 1 }
 0x13b   :  { %375 = vsyncpa [#allocation4 + $0x1], 1 }
 0x13c   :  { %376 = vsyncpa [#allocation7], 1 }
 0x13d   :  { %377 = vsyncpa [#allocation5], 1 }
 0x13e   :  { %379 = vsyncpa [#allocation5 + $0x1], 1 }

</bundles_post_ra>
